<compile_context>
chip_gen: v5e
topology: v5e:2x2
jax: 0.10.0
libtpu: 0.0.40
codegen_flags: <defaults>
</compile_context>

<pallas_src>
import jax
import jax.numpy as jnp
from jax.experimental import pallas as pl
from jax.experimental.pallas import tpu as pltpu

IN_FEATURES = 32
OUT_FEATURES = 2
BATCH = 8

_INV_N = 1.0 / float(BATCH * OUT_FEATURES)  # compile-time constant for the mean


def boring_kernel(slab_ref, loss_ref):
    # slab_ref: (BATCH + OUT_FEATURES, 32) VMEM  -- rows 0:8 are x, rows 8:10 are
    #           the weight in PyTorch (out, in) layout (K=32 on the lane axis).
    # loss_ref: (1, 1) SMEM scalar output.
    x = slab_ref[0:BATCH, :].astype(jnp.float32)                    # (8, 32)
    w0 = slab_ref[BATCH:BATCH + 1, :].astype(jnp.float32)           # (1, 32)
    w1 = slab_ref[BATCH + 1:BATCH + 2, :].astype(jnp.float32)       # (1, 32)

    # VPU dot: broadcast each weight row over sublanes, multiply, lane-reduce.
    # keepdims=True keeps everything 2-D (no relayout-prone (8,) vectors).
    y0 = jnp.sum(x * w0, axis=-1, keepdims=True)                    # (8, 1)
    y1 = jnp.sum(x * w1, axis=-1, keepdims=True)                    # (8, 1)

    # Fused MSE vs. ones: one reduction over all B*OUT squared errors.
    d0 = y0 - jnp.float32(1.0)
    d1 = y1 - jnp.float32(1.0)
    ss = jnp.sum(d0 * d0 + d1 * d1)                                 # scalar
    loss_ref[0, 0] = ss * jnp.float32(_INV_N)


def boring_model_forward(x, w):
    """x: (B, 32) f32, w: (2, 32) f32 (PyTorch (out, in)) -> scalar f32 MSE loss."""
    # One merged input slab: both arrays pad to the same (8,128) f32 tiling
    # anyway, so a single (10,32) slab means a single prologue DMA.
    slab = jnp.concatenate([x, w], axis=0)  # (BATCH + OUT_FEATURES, 32)

    cost = pl.CostEstimate(
        flops=2 * BATCH * IN_FEATURES * OUT_FEATURES,
        transcendentals=0,
        bytes_accessed=(BATCH + OUT_FEATURES) * IN_FEATURES * 4 + 4,
    )
    loss = pl.pallas_call(
        boring_kernel,
        out_shape=jax.ShapeDtypeStruct((1, 1), jnp.float32),
        in_specs=[pl.BlockSpec(memory_space=pltpu.MemorySpace.VMEM)],
        out_specs=pl.BlockSpec(memory_space=pltpu.MemorySpace.SMEM),
        cost_estimate=cost,
    )(slab)
    return loss[0, 0]


if __name__ == "__main__":
    key = jax.random.PRNGKey(0)
    kx, kw = jax.random.split(key)

    # Deterministic inputs / params.
    x = jax.random.normal(kx, (BATCH, IN_FEATURES), dtype=jnp.float32)
    # PyTorch nn.Linear default init: U(-1/sqrt(in), 1/sqrt(in)); weight is (out, in).
    bound = 1.0 / (IN_FEATURES ** 0.5)
    w = jax.random.uniform(
        kw, (OUT_FEATURES, IN_FEATURES), dtype=jnp.float32, minval=-bound, maxval=bound
    )  # kept in (out, in) layout — no transpose needed

    loss = boring_model_forward(x, w)
    jax.block_until_ready(loss)

    # Pure-JAX reference check (same math as torch: x @ W^T, then MSE vs. ones).
    ref = jnp.mean((x @ w.T - 1.0) ** 2)
    assert jnp.allclose(loss, ref, rtol=1e-5, atol=1e-5), (loss, ref)

    print("KERNEL_OK")
</pallas_src>

<mosaic_0001>
module attributes {stable_mosaic.version = 11 : i64} {
  func.func @boring_kernel(%arg0: memref<10x32xf32, #tpu.memory_space<vmem>>, %arg1: memref<1x1xf32, #tpu.memory_space<smem>>) attributes {dimension_semantics = [], scalar_prefetch = 0 : i64, scratch_operands = 0 : i64, tpu.core_type = #tpu.core_type<tc>} {
    %c0 = arith.constant 0 : index
    %c0_0 = arith.constant 0 : index
    %0 = vector.load %arg0[%c0, %c0_0] : memref<10x32xf32, #tpu.memory_space<vmem>>, vector<8x32xf32>
    %c8 = arith.constant 8 : index
    %c0_1 = arith.constant 0 : index
    %1 = vector.load %arg0[%c8, %c0_1] : memref<10x32xf32, #tpu.memory_space<vmem>>, vector<1x32xf32>
    %c9 = arith.constant 9 : index
    %c0_2 = arith.constant 0 : index
    %2 = vector.load %arg0[%c9, %c0_2] : memref<10x32xf32, #tpu.memory_space<vmem>>, vector<1x32xf32>
    %3 = vector.broadcast %1 : vector<1x32xf32> to vector<8x32xf32>
    %4 = arith.mulf %0, %3 : vector<8x32xf32>
    %cst = arith.constant dense<0.000000e+00> : vector<8xf32>
    %5 = vector.multi_reduction <add>, %4, %cst [1] : vector<8x32xf32> to vector<8xf32>
    %6 = vector.shape_cast %5 : vector<8xf32> to vector<8x1xf32>
    %7 = vector.broadcast %2 : vector<1x32xf32> to vector<8x32xf32>
    %8 = arith.mulf %0, %7 : vector<8x32xf32>
    %cst_3 = arith.constant dense<0.000000e+00> : vector<8xf32>
    %9 = vector.multi_reduction <add>, %8, %cst_3 [1] : vector<8x32xf32> to vector<8xf32>
    %10 = vector.shape_cast %9 : vector<8xf32> to vector<8x1xf32>
    %cst_4 = arith.constant 1.000000e+00 : f32
    %11 = vector.broadcast %cst_4 : f32 to vector<8x1xf32>
    %12 = arith.subf %6, %11 : vector<8x1xf32>
    %cst_5 = arith.constant 1.000000e+00 : f32
    %13 = vector.broadcast %cst_5 : f32 to vector<8x1xf32>
    %14 = arith.subf %10, %13 : vector<8x1xf32>
    %15 = arith.mulf %12, %12 : vector<8x1xf32>
    %16 = arith.mulf %14, %14 : vector<8x1xf32>
    %17 = arith.addf %15, %16 : vector<8x1xf32>
    %18 = vector.shape_cast %17 : vector<8x1xf32> to vector<1x8x1xf32>
    %cst_6 = arith.constant dense<0.000000e+00> : vector<1xf32>
    %19 = vector.multi_reduction <add>, %18, %cst_6 [1, 2] : vector<1x8x1xf32> to vector<1xf32>
    %20 = vector.shape_cast %19 : vector<1xf32> to vector<1x1x1xf32>
    %21 = vector.extract %20[0, 0, 0] : f32 from vector<1x1x1xf32>
    %cst_7 = arith.constant 6.250000e-02 : f32
    %22 = arith.mulf %21, %cst_7 : f32
    %c0_8 = arith.constant 0 : index
    %c0_9 = arith.constant 0 : index
    %23 = memref.load %arg1[%c0_8, %c0_9] : memref<1x1xf32, #tpu.memory_space<smem>>
    memref.store %22, %arg1[%c0_8, %c0_9] : memref<1x1xf32, #tpu.memory_space<smem>>
    return
  }
}

</mosaic_0001>

<bundles_post_ra>
// kernel: tpu_custom_call.1
= control target key start
LH: loop header
LB: loop body
LE: loop exit
PB: predicated region body
PF: predicated region fallthrough
CT: control target
= control target key end

     0   :  { %6 = vsyncpa [#allocation3], 0  ;;  %s144_s0 = inlined_call_operand.hbm [shape: f32[10,32], index: 0, kind: input, shape index: {}]   ;;  %s145_s1 = inlined_call_operand.hbm [shape: f32[1,1], index: 1, kind: output, shape index: {}]  }
   0x1   :  { %7 = vsyncpa [#allocation4], 0  ;;  %s12_s8 = sshll.u32 %s144_s0, 4  ;;  %s124_s9 = smov [#allocation2]   ;;  %s13_s8 = int_to_ptr.hbm [resolvable:$true] %s12_s8 }
   0x2   :  { %s14_s10 = sshll.u32 %s124_s9, 4  ;;  %s125_s11 = smov 128   ;;  %s15_s10 = int_to_ptr.vmem [resolvable:$true] %s14_s10 }
   0x3   :  { %s126_s12 = smov 8  }
   0x4   :  { %20 = dma.hbm_to_vmem [thread:$0]  %s13_s8, 256, %s15_s10, [#allocation3], %s125_s11, %s125_s11, %s126_s12  }
   0x5   :  { %120 = dma.done.wait [#allocation3], 256  }
   0x6   :  { %121 = vsyncadd [#allocation3], 4294967040  ;;  %v25_v0 = vld [vmem:[#allocation2] sm:$0xff]  ;;  %v82_v1 = vld [vmem:[#allocation2 + $0x8] ss:$0 sm:$0xff]  ;;  %vm30_vm0 = vcmask 261120  }
   0x7   :  { %v29_v2 = vmul.f32 %v82_v1, %v25_v0  ;;  %v83_v3 = vld [vmem:[#allocation2 + $0x9] ss:$0 sm:$0xff]  ;;  %vm44_vm1 = vcmask 7168   ;;  %s63_s14 = sshll.u32 %s145_s1, 4  ;;  %s127_s17 = smov [#allocation5]   ;;  %s64_s14 = int_to_ptr.hbm [resolvable:$true] %s63_s14 }
   0x8   :  { %v35_v5 = vmul.f32 %v83_v3, %v25_v0 }
   0x9   :  { %v31_v4 = vsel %vm30_vm0, %v29_v2, 0.0 }
   0xa   :  { %32 = vadd.xlane.f32.xlu0 %v31_v4  ;;  %v36_v6 = vsel %vm30_vm0, %v35_v5, 0.0 }
  0x12   :  { %37 = vadd.xlane.f32.xlu0 %v36_v6 }
  0x7d   :  { %v33_v7 = vpop.xlane.xlu0 %32 }
  0x7e   :  { %v74_v8 = vadd.f32 -1.0, %v33_v7 }
  0x80   :  { %v41_v11 = vmul.f32 %v74_v8, %v74_v8 }
  0x85   :  { %v38_v9 = vpop.xlane.xlu0 %37 }
  0x86   :  { %v75_v10 = vadd.f32 -1.0, %v38_v9 }
  0x88   :  { %v42_v12 = vmul.f32 %v75_v10, %v75_v10 }
  0x8a   :  { %v43_v13 = vadd.f32 %v42_v12, %v41_v11 }
  0x8c   :  { %v45_v14 = vsel %vm44_vm1, %v43_v13, 0.0 }
  0x8d   :  { %46 = vadd.xlane.f32.xlu1 %v45_v14 }
 0x100   :  { %v47_v15 = vpop.xlane.xlu1 %46 }
 0x101   :  { %v48_v16 = vrot.slane %v47_v15, 4 }
 0x103   :  { %v49_v17 = vadd.f32 %v48_v16, %v47_v15 }
 0x105   :  { %v50_v18 = vrot.slane %v49_v17, 2 }
 0x107   :  { %v51_v19 = vadd.f32 %v50_v18, %v49_v17 }
 0x109   :  { %v52_v20 = vrot.slane %v51_v19, 1 }
 0x10b   :  { %v53_v21 = vadd.f32 %v52_v20, %v51_v19 }
 0x10d   :  { %76 = vpush %v53_v21 }
 0x13e   :  { %s77_s15 = spop %76 }
 0x13f   :  { %s55_s16 = smul.f32 0.0625, %s77_s15 }
 0x141   :  { %57 = sst [smem:[#allocation5]] %s55_s16 }
 0x142   :  { %66 = dma.smem_to_hbm %s127_s17, 16, %s64_s14, [#allocation4]  }
 0x143   :  { %122 = dma.done.wait [#allocation4], 16  }
 0x144   :  { %123 = vsyncadd [#allocation4], 4294967280 }
 0x145   :  { %71 = sfence }
 0x146   :  { %72 = vsyncpa [#allocation3], 1 }
 0x147   :  { %73 = vsyncpa [#allocation4], 1 }

</bundles_post_ra>
